<compile_context>
chip_gen: v5e
topology: v5e:2x2
jax: 0.10.0
libtpu: 0.0.40
codegen_flags: <defaults>
</compile_context>

<pallas_src>
import jax
import jax.numpy as jnp
from jax import lax
from jax.experimental import pallas as pl
from jax.experimental.pallas import tpu as pltpu

_EPS = 1e-5


def _ln_kernel(x_ref, w_ref, o_ref):
    # x_ref: (tr, C)   w_ref: (1, C)   o_ref: (tr, C)
    x = x_ref[...].astype(jnp.float32)
    mu = jnp.mean(x, axis=-1, keepdims=True)
    xc = x - mu
    var = jnp.mean(xc * xc, axis=-1, keepdims=True)   # unbiased=False variance
    inv = lax.rsqrt(var + _EPS)                        # EUP slot, ~free
    w = w_ref[...].astype(jnp.float32)
    o_ref[...] = (x * inv * w).astype(o_ref.dtype)     # x NOT centered (bias-free)


def _pick_row_tile(rows, c, itemsize, target_bytes=1 << 20):
    """Largest row tile that (a) keeps one block <= ~target_bytes, (b) divides
    `rows` exactly, and (c) is a multiple of 8 (sublane rule). Falls back to a
    single full-extent block when no such tile exists or rows are small."""
    max_rows = max(8, target_bytes // max(1, c * itemsize))
    if rows <= max_rows:
        return rows
    tr = (max_rows // 8) * 8
    while tr >= 8:
        if rows % tr == 0:
            return tr
        tr -= 8
    return rows  # no clean tiling: one full-extent block


def bias_free_layer_norm(x, weight):
    """x: (..., C), weight: (C,) -> same shape/dtype as x."""
    orig_shape = x.shape
    C = orig_shape[-1]
    assert weight.shape == (C,)

    rows = 1
    for d in orig_shape[:-1]:
        rows *= d
    x2 = x.reshape(rows, C)
    w2 = weight.reshape(1, C)

    tr = _pick_row_tile(rows, C, x2.dtype.itemsize)
    grid = (rows // tr,)

    out = pl.pallas_call(
        _ln_kernel,
        out_shape=jax.ShapeDtypeStruct((rows, C), x.dtype),
        grid_spec=pltpu.PrefetchScalarGridSpec(
            num_scalar_prefetch=0,
            grid=grid,
            in_specs=[
                pl.BlockSpec((tr, C), lambda i: (i, 0)),   # row tile of x
                pl.BlockSpec((1, C), lambda i: (0, 0)),    # weight, reused
            ],
            out_specs=pl.BlockSpec((tr, C), lambda i: (i, 0)),
        ),
        compiler_params=pltpu.CompilerParams(
            dimension_semantics=("parallel",)),
    )(x2, w2)
    return out.reshape(orig_shape)


def bias_free_layer_norm_ref(x, weight):
    """Pure-JAX reference (mirrors the PyTorch BiasFree_LayerNorm.forward)."""
    mu = jnp.mean(x, axis=-1, keepdims=True)
    var = jnp.mean((x - mu) ** 2, axis=-1, keepdims=True)
    return x / jnp.sqrt(var + _EPS) * weight


if __name__ == "__main__":
    key = jax.random.PRNGKey(0)
    kx, kw = jax.random.split(key)

    # Small shapes consistent with the module: batch=2, seq=8, hidden=32.
    B, N, C = 2, 8, 32
    x = jax.random.normal(kx, (B, N, C), dtype=jnp.float32)
    weight = jnp.ones((C,), dtype=jnp.float32)  # module init: torch.ones

    out = jax.block_until_ready(bias_free_layer_norm(x, weight))
    ref = bias_free_layer_norm_ref(x, weight)
    assert out.shape == x.shape and out.dtype == x.dtype
    assert jnp.allclose(out, ref, atol=1e-5, rtol=1e-5)

    # Non-trivial weight to exercise the scale path as well.
    w2 = 1.0 + 0.1 * jax.random.normal(kw, (C,), dtype=jnp.float32)
    out2 = jax.block_until_ready(bias_free_layer_norm(x, w2))
    assert jnp.allclose(out2, bias_free_layer_norm_ref(x, w2), atol=1e-5, rtol=1e-5)

    print("KERNEL_OK")
</pallas_src>

<mosaic_0001>
module attributes {stable_mosaic.version = 11 : i64} {
  func.func @_ln_kernel(%arg0: i32, %arg1: memref<16x32xf32, #tpu.memory_space<vmem>>, %arg2: memref<1x32xf32, #tpu.memory_space<vmem>>, %arg3: memref<16x32xf32, #tpu.memory_space<vmem>>) attributes {dimension_semantics = [#tpu.dimension_semantics<parallel>], iteration_bounds = array<i64: 1>, scalar_prefetch = 0 : i64, scratch_operands = 0 : i64, tpu.core_type = #tpu.core_type<tc>, window_params = [{transform_indices = @transform_0, window_bounds = array<i64: 16, 32>}, {pipeline_mode = #tpu.pipeline_mode<synchronous>, transform_indices = @transform_1, window_bounds = array<i64: 1, 32>}, {transform_indices = @transform_2, window_bounds = array<i64: 16, 32>}]} {
    %c0 = arith.constant 0 : index
    %c0_0 = arith.constant 0 : index
    %0 = vector.load %arg1[%c0, %c0_0] : memref<16x32xf32, #tpu.memory_space<vmem>>, vector<16x32xf32>
    %cst = arith.constant dense<0.000000e+00> : vector<16xf32>
    %1 = vector.multi_reduction <add>, %0, %cst [1] : vector<16x32xf32> to vector<16xf32>
    %2 = vector.shape_cast %1 : vector<16xf32> to vector<16x1xf32>
    %cst_1 = arith.constant 3.200000e+01 : f32
    %3 = vector.broadcast %cst_1 : f32 to vector<16x1xf32>
    %4 = arith.divf %2, %3 : vector<16x1xf32>
    %5 = vector.broadcast %4 : vector<16x1xf32> to vector<16x32xf32>
    %6 = arith.subf %0, %5 : vector<16x32xf32>
    %7 = arith.mulf %6, %6 : vector<16x32xf32>
    %cst_2 = arith.constant dense<0.000000e+00> : vector<16xf32>
    %8 = vector.multi_reduction <add>, %7, %cst_2 [1] : vector<16x32xf32> to vector<16xf32>
    %9 = vector.shape_cast %8 : vector<16xf32> to vector<16x1xf32>
    %cst_3 = arith.constant 3.200000e+01 : f32
    %10 = vector.broadcast %cst_3 : f32 to vector<16x1xf32>
    %11 = arith.divf %9, %10 : vector<16x1xf32>
    %cst_4 = arith.constant 9.99999974E-6 : f32
    %12 = vector.broadcast %cst_4 : f32 to vector<16x1xf32>
    %13 = arith.addf %11, %12 : vector<16x1xf32>
    %14 = math.rsqrt %13 : vector<16x1xf32>
    %c0_5 = arith.constant 0 : index
    %c0_6 = arith.constant 0 : index
    %15 = vector.load %arg2[%c0_5, %c0_6] : memref<1x32xf32, #tpu.memory_space<vmem>>, vector<1x32xf32>
    %16 = vector.broadcast %14 : vector<16x1xf32> to vector<16x32xf32>
    %17 = arith.mulf %0, %16 : vector<16x32xf32>
    %18 = vector.broadcast %15 : vector<1x32xf32> to vector<16x32xf32>
    %19 = arith.mulf %17, %18 : vector<16x32xf32>
    %c0_7 = arith.constant 0 : index
    %c0_8 = arith.constant 0 : index
    %20 = vector.load %arg3[%c0_7, %c0_8] : memref<16x32xf32, #tpu.memory_space<vmem>>, vector<16x32xf32>
    tpu.vector_store %arg3[%c0_7, %c0_8], %19 {strides = array<i32>} : memref<16x32xf32, #tpu.memory_space<vmem>>, vector<16x32xf32>,
    return
  }
  func.func @transform_0(%arg0: i32) -> (i32, i32) {
    %c0_i32 = arith.constant 0 : i32
    %c0_i32_0 = arith.constant 0 : i32
    return %arg0, %c0_i32 : i32, i32
  }
  func.func @transform_1(%arg0: i32) -> (i32, i32) {
    %c0_i32 = arith.constant 0 : i32
    %c0_i32_0 = arith.constant 0 : i32
    %c0_i32_1 = arith.constant 0 : i32
    return %c0_i32, %c0_i32_0 : i32, i32
  }
  func.func @transform_2(%arg0: i32) -> (i32, i32) {
    %c0_i32 = arith.constant 0 : i32
    %c0_i32_0 = arith.constant 0 : i32
    return %arg0, %c0_i32 : i32, i32
  }
}

</mosaic_0001>

<bundles_post_ra>
// kernel: tpu_custom_call.1
= control target key start
LH: loop header
LB: loop body
LE: loop exit
PB: predicated region body
PF: predicated region fallthrough
CT: control target
= control target key end

     0   :  { %7 = vsyncpa [#allocation3], 0  ;;  %s257_s0 = inlined_call_operand.hbm [shape: f32[16,32], index: 0, kind: input, shape index: {}]   ;;  %s258_s1 = inlined_call_operand.hbm [shape: f32[1,32], index: 1, kind: input, shape index: {}]   ;;  %s259_s2 = inlined_call_operand.hbm [shape: f32[16,32], index: 2, kind: output, shape index: {}]  }
   0x1   :  { %8 = vsyncpa [#allocation6], 0 }
   0x2   :  { %9 = vsyncpa [#allocation4], 0  ;;  %s14_s11 = sshll.u32 %s257_s0, 4  ;;  %s215_s12 = smov [#allocation2]   ;;  %s15_s11 = int_to_ptr.hbm [resolvable:$true] %s14_s11 }
   0x3   :  { %s16_s13 = sshll.u32 %s215_s12, 4  ;;  %s28_s16 = sshll.u32 %s258_s1, 4  ;;  %s17_s13 = int_to_ptr.vmem [resolvable:$true] %s16_s13  ;;  %s29_s16 = int_to_ptr.hbm [resolvable:$true] %s28_s16 }
   0x4   :  { %s216_s17 = smov 128   ;;  %s217_s18 = smov 8  }
   0x5   :  { %22 = dma.hbm_to_vmem [thread:$0]  %s15_s11, 256, %s17_s13, [#allocation3], %s216_s17, %s216_s17, %s217_s18  }
   0x6   :  { %s218_s19 = smov [#allocation5]  }
   0x7   :  { %s30_s20 = sshll.u32 %s218_s19, 4  ;;  %s31_s20 = int_to_ptr.vmem [resolvable:$true] %s30_s20 }
   0x8   :  { %33 = dma.hbm_to_vmem [thread:$0]  %s29_s16, 16, %s31_s20, [#allocation6]  }
   0x9   :  { %209 = dma.done.wait [#allocation3], 256  }
   0xa   :  { %210 = vsyncadd [#allocation3], 4294967040 }
   0xb   :  { %211 = dma.done.wait [#allocation6], 16  }
   0xc   :  { %212 = vsyncadd [#allocation6], 4294967280  ;;  %vm44_vm0 = vcmask 261120   ;;  %v42_v0 = vld [vmem:[#allocation2] sm:$0xff]  ;;  %v43_v2 = vld [vmem:[#allocation2 + $0x8] sm:$0xff]  ;;  %v219_v4 = vmov 32.0  }
   0xd   :  { %v45_v1 = vsel %vm44_vm0, %v42_v0, 0.0  ;;  %v48_v3 = vsel %vm44_vm0, %v43_v2, 0.0  ;;  %131 = vrcp.f32 %v219_v4  ;;  %v130_v35 = vld [vmem:[#allocation5] ss:$0 sm:$0xff]  ;;  %s220_s0 = smov [#allocation7]   ;;  %s110_s23 = sshll.u32 %s259_s2, 4  ;;  %s111_s23 = int_to_ptr.hbm [resolvable:$true] %s110_s23 }
   0xe   :  { %46 = vadd.xlane.f32.xlu0 %v45_v1  ;;  %s108_s1 = sshll.u32 %s220_s0, 4  ;;  %s109_s1 = int_to_ptr.vmem [resolvable:$true] %s108_s1 }
  0x13   :  { %v132_v5 = vpop.eup %131 }
  0x14   :  { %v52_v6 = vmul.f32 32.0, %v132_v5  ;;  %vm56_vm1 = vweird.f32 %v132_v5 }
  0x16   :  { %49 = vadd.xlane.f32.xlu0 %v48_v3  ;;  %v53_v7 = vsub.f32 1.0, %v52_v6 }
  0x18   :  { %v54_v8 = vmul.f32 %v132_v5, %v53_v7 }
  0x1a   :  { %v55_v9 = vadd.f32 %v132_v5, %v54_v8 }
  0x1c   :  { %v57_v10 = vsel %vm56_vm1, %v132_v5, %v55_v9 }
  0x81   :  { %v47_v11 = vpop.xlane.xlu0 %46 }
  0x82   :  { %v58_v12 = vmul.f32 %v57_v10, %v47_v11 }
  0x84   :  { %v60_v13 = vsub.f32 %v42_v0, %v58_v12 }
  0x86   :  { %v62_v14 = vmul.f32 %v60_v13, %v60_v13 }
  0x88   :  { %v64_v15 = vsel %vm44_vm0, %v62_v14, 0.0 }
  0x89   :  { %65 = vadd.xlane.f32.xlu1 %v64_v15  ;;  %v50_v16 = vpop.xlane.xlu0 %49 }
  0x8a   :  { %v59_v17 = vmul.f32 %v57_v10, %v50_v16 }
  0x8c   :  { %v61_v18 = vsub.f32 %v43_v2, %v59_v17 }
  0x8e   :  { %v63_v19 = vmul.f32 %v61_v18, %v61_v18 }
  0x90   :  { %v67_v20 = vsel %vm44_vm0, %v63_v19, 0.0 }
  0x91   :  { %68 = vadd.xlane.f32.xlu1 %v67_v20 }
  0xfc   :  { %v66_v21 = vpop.xlane.xlu1 %65 }
  0xfd   :  { %v70_v22 = vmul.f32 %v66_v21, %v57_v10 }
  0xff   :  { %v72_v23 = vadd.f32 1e-05, %v70_v22 }
 0x101   :  { %133 = vrsqrt.f32 %v72_v23  ;;  %vm80_vm3 = vweird.f32 %v72_v23 }
 0x104   :  { %v69_v24 = vpop.xlane.xlu1 %68 }
 0x105   :  { %v71_v25 = vmul.f32 %v69_v24, %v57_v10 }
 0x107   :  { %v134_v26 = vpop.eup %133  ;;  %v73_v27 = vadd.f32 1e-05, %v71_v25 }
 0x108   :  { %v75_v28 = vmul.f32 %v134_v26, %v72_v23  ;;  %vm81_vm2 = vweird.f32 %v134_v26 }
 0x109   :  { %135 = vrsqrt.f32 %v73_v27  ;;  %vm82_vm4 = vmor %vm80_vm3, %vm81_vm2  ;;  %vm90_vm6 = vweird.f32 %v73_v27 }
 0x10a   :  { %v76_v29 = vmul.f32 %v134_v26, %v75_v28 }
 0x10c   :  { %v77_v30 = vmul.f32 0.5, %v76_v29 }
 0x10e   :  { %v78_v31 = vsub.f32 1.5, %v77_v30 }
 0x10f   :  { %v136_v32 = vpop.eup %135 }
 0x110   :  { %v79_v33 = vmul.f32 %v134_v26, %v78_v31  ;;  %v85_v34 = vmul.f32 %v136_v32, %v73_v27  ;;  %vm91_vm5 = vweird.f32 %v136_v32 }
 0x111   :  { %vm92_vm7 = vmor %vm90_vm6, %vm91_vm5 }
 0x112   :  { %v83_v36 = vsel %vm82_vm4, %v134_v26, %v79_v33  ;;  %v86_v37 = vmul.f32 %v136_v32, %v85_v34 }
 0x113   :  { %v95_v38 = vmul.f32 %v83_v36, %v42_v0 }
 0x114   :  { %v87_v39 = vmul.f32 0.5, %v86_v37 }
 0x115   :  { %v100_v40 = vmul.f32 %v130_v35, %v95_v38 }
 0x116   :  { %v88_v41 = vsub.f32 1.5, %v87_v39 }
 0x117   :  { %102 = vst.msk [vmem:[#allocation7] sm:$0xff] %vm44_vm0, %v100_v40 }
 0x118   :  { %v89_v42 = vmul.f32 %v136_v32, %v88_v41 }
 0x11a   :  { %v93_v43 = vsel %vm92_vm7, %v136_v32, %v89_v42 }
 0x11b   :  { %v96_v44 = vmul.f32 %v93_v43, %v43_v2 }
 0x11d   :  { %v101_v45 = vmul.f32 %v130_v35, %v96_v44 }
 0x11f   :  { %103 = vst.msk [vmem:[#allocation7 + $0x8] sm:$0xff] %vm44_vm0, %v101_v45 }
 0x120   :  { %116 = dma.vmem_to_hbm [thread:$0]  %s109_s1, 256, %s111_s23, [#allocation4], %s216_s17, %s216_s17, %s217_s18  }
 0x121   :  { %213 = dma.done.wait [#allocation4], 256  }
 0x122   :  { %214 = vsyncadd [#allocation4], 4294967040 }
 0x123   :  { %121 = vsyncpa [#allocation3], 1 }
 0x124   :  { %122 = vsyncpa [#allocation6], 1 }
 0x125   :  { %123 = vsyncpa [#allocation4], 1 }

</bundles_post_ra>
